<compile_context>
chip_gen: v6e
topology: v6e:2x2x1
jax: 0.10.0
libtpu: 0.0.40
codegen_flags: <defaults>
</compile_context>

<pallas_src>
import numpy as np

import jax
import jax.numpy as jnp
from jax.experimental import pallas as pl
from jax.experimental.pallas import tpu as pltpu

EPS = 1e-5


def _pack_conv3x3_weights(w_hwio, width):
    """Fold the 3 dw taps of a 3x3 conv into banded (W*Cin, W*Cout) matrices.

    Returns (3, W*Cin, W*Cout): one lane-dense matmul operand per dh tap.
    M[kh, w_in*Cin + ci, w_out*Cout + co] = w[kh, w_in - w_out + 1, ci, co]
    (zero outside the 3-wide band -> SAME zero padding along W for free).
    """
    w = np.asarray(w_hwio, dtype=np.float32)
    kh_, kw_, cin, cout = w.shape
    mats = np.zeros((kh_, width * cin, width * cout), np.float32)
    for kh in range(kh_):
        for w_out in range(width):
            for kw in range(kw_):
                w_in = w_out + kw - 1
                if 0 <= w_in < width:
                    mats[kh,
                         w_in * cin:(w_in + 1) * cin,
                         w_out * cout:(w_out + 1) * cout] = w[kh, kw]
    return jnp.asarray(mats)


def basic_block_pallas(x_nhwc, w1_hwio, w2_hwio, g1, b1, g2, b2):
    N, H, W, C = x_nhwc.shape
    R, L = N * H, W * C
    assert L % 128 == 0, "lane-dense layout assumes W*C is a multiple of 128"

    # ---- wrapper-side packing (weights / params only, no activation compute) ----
    x2d = x_nhwc.reshape(R, L).astype(jnp.float32)               # (N*H, W*C), pure view
    wm1 = _pack_conv3x3_weights(w1_hwio, W).astype(jnp.bfloat16)  # (3, L, L)
    wm2 = _pack_conv3x3_weights(w2_hwio, W).astype(jnp.bfloat16)
    g1v = jnp.tile(jnp.asarray(g1, jnp.float32).reshape(1, C), (1, W))  # lane j -> g[j % C]
    b1v = jnp.tile(jnp.asarray(b1, jnp.float32).reshape(1, C), (1, W))
    g2v = jnp.tile(jnp.asarray(g2, jnp.float32).reshape(1, C), (1, W))
    b2v = jnp.tile(jnp.asarray(b2, jnp.float32).reshape(1, C), (1, W))
    lane = np.arange(L)
    pool = jnp.asarray(lane[:, None] % C == lane[None, :] % C, jnp.float32)  # (L, L) 0/1

    inv_count = 1.0 / float(R * W)   # 1 / (N*H*W): per-channel element count

    def kernel(x_ref, w1_ref, w2_ref, g1_ref, b1_ref, g2_ref, b2_ref,
               pool_ref, o_ref):
        x = x_ref[...]                                           # (R, L) f32
        pool_m = pool_ref[...]                                   # (L, L) f32
        row = jax.lax.broadcasted_iota(jnp.int32, (R, L), 0)
        h = row % H
        not_top = h != 0          # dh = -1 tap invalid on the first image row
        not_bot = h != H - 1      # dh = +1 tap invalid on the last image row

        def conv_bn(inp, w_ref, g_ref, b_ref, relu):
            # dh shifts: sublane rolls (XLU) + zero mask at image boundaries.
            up = jnp.where(not_top, pltpu.roll(inp, 1, axis=0), 0.0)       # x[r-1]
            down = jnp.where(not_bot, pltpu.roll(inp, R - 1, axis=0), 0.0)  # x[r+1]
            # 3 lane-dense bf16 MXU matmuls, f32 accumulation (dw taps are in the bands).
            acc = jnp.dot(up.astype(jnp.bfloat16), w_ref[0],
                          preferred_element_type=jnp.float32)
            acc = acc + jnp.dot(inp.astype(jnp.bfloat16), w_ref[1],
                                preferred_element_type=jnp.float32)
            acc = acc + jnp.dot(down.astype(jnp.bfloat16), w_ref[2],
                                preferred_element_type=jnp.float32)
            # Training-mode BN, single-pass stats in f32; 0/1 pooling matmul gathers
            # + broadcasts per-channel sums across the W lane-slots of each channel.
            s1 = jnp.sum(acc, axis=0, keepdims=True)             # (1, L)
            s2 = jnp.sum(acc * acc, axis=0, keepdims=True)       # (1, L)
            mean = jnp.dot(s1, pool_m, preferred_element_type=jnp.float32) * inv_count
            ex2 = jnp.dot(s2, pool_m, preferred_element_type=jnp.float32) * inv_count
            var = ex2 - mean * mean
            y = (acc - mean) * jax.lax.rsqrt(var + EPS) * g_ref[...] + b_ref[...]
            return jnp.maximum(y, 0.0) if relu else y

        out = conv_bn(x, w1_ref, g1_ref, b1_ref, relu=True)      # conv1 + bn1 + relu
        out = conv_bn(out, w2_ref, g2_ref, b2_ref, relu=False)   # conv2 + bn2
        o_ref[...] = jnp.maximum(out + x, 0.0)                   # += identity, relu

    # TODO(synk): training-mode BN needs full-batch statistics, so a naive parallel
    # grid over N (to occupy v7x's second TensorCore) would change the math; at this
    # size the whole block fits comfortably in VMEM in a single invocation.
    vmem = pl.BlockSpec(memory_space=pltpu.MemorySpace.VMEM)
    out2d = pl.pallas_call(
        kernel,
        out_shape=jax.ShapeDtypeStruct((R, L), jnp.float32),
        in_specs=[vmem] * 8,
        out_specs=vmem,
    )(x2d, wm1, wm2, g1v, b1v, g2v, b2v, pool)
    return out2d.reshape(N, H, W, C)


def basic_block_reference(x_nhwc, w1_hwio, w2_hwio, g1, b1, g2, b2):
    """Pure-JAX reference (same math, NHWC) for a sanity check."""
    def conv(x, w):
        return jax.lax.conv_general_dilated(
            x, w, window_strides=(1, 1), padding='SAME',
            dimension_numbers=('NHWC', 'HWIO', 'NHWC'))

    def bn(y, g, b):
        mean = jnp.mean(y, axis=(0, 1, 2), keepdims=True)
        var = jnp.mean((y - mean) ** 2, axis=(0, 1, 2), keepdims=True)
        return (y - mean) * jax.lax.rsqrt(var + EPS) * g.reshape(1, 1, 1, -1) \
            + b.reshape(1, 1, 1, -1)

    out = jax.nn.relu(bn(conv(x_nhwc, w1_hwio), g1, b1))
    out = bn(conv(out, w2_hwio), g2, b2)
    return jax.nn.relu(out + x_nhwc)


if __name__ == "__main__":
    # BasicBlock(inplanes=8, planes=8, stride=1, downsample=None, groups=1)
    N, C, H, W = 2, 8, 16, 16          # W*C = 128 -> lane-dense layout

    key = jax.random.PRNGKey(0)
    kx, kw1, kw2 = jax.random.split(key, 3)

    # PyTorch-style NCHW input (module's native layout) -> NHWC for the kernel.
    x_nchw = jax.random.normal(kx, (N, C, H, W), dtype=jnp.float32)
    x_nhwc = jnp.transpose(x_nchw, (0, 2, 3, 1))

    # Deterministic synthetic conv weights (HWIO); BN affine at PyTorch defaults.
    w1_hwio = 0.1 * jax.random.normal(kw1, (3, 3, C, C), dtype=jnp.float32)
    w2_hwio = 0.1 * jax.random.normal(kw2, (3, 3, C, C), dtype=jnp.float32)
    g1 = jnp.ones((C,), jnp.float32)
    b1 = jnp.zeros((C,), jnp.float32)
    g2 = jnp.ones((C,), jnp.float32)
    b2 = jnp.zeros((C,), jnp.float32)

    out = basic_block_pallas(x_nhwc, w1_hwio, w2_hwio, g1, b1, g2, b2)
    out = jax.block_until_ready(out)

    ref = basic_block_reference(x_nhwc, w1_hwio, w2_hwio, g1, b1, g2, b2)
    ref = jax.block_until_ready(ref)

    np.testing.assert_allclose(np.asarray(out), np.asarray(ref),
                               rtol=5e-2, atol=5e-2)
    print("KERNEL_OK")
</pallas_src>

<mosaic_0001>
module attributes {stable_mosaic.version = 11 : i64} {
  func.func @kernel(%arg0: memref<32x128xf32, #tpu.memory_space<vmem>>, %arg1: memref<3x128x128xbf16, #tpu.memory_space<vmem>>, %arg2: memref<3x128x128xbf16, #tpu.memory_space<vmem>>, %arg3: memref<1x128xf32, #tpu.memory_space<vmem>>, %arg4: memref<1x128xf32, #tpu.memory_space<vmem>>, %arg5: memref<1x128xf32, #tpu.memory_space<vmem>>, %arg6: memref<1x128xf32, #tpu.memory_space<vmem>>, %arg7: memref<128x128xf32, #tpu.memory_space<vmem>>, %arg8: memref<32x128xf32, #tpu.memory_space<vmem>>) attributes {dimension_semantics = [], scalar_prefetch = 0 : i64, scratch_operands = 0 : i64, tpu.core_type = #tpu.core_type<tc>} {
    %c0 = arith.constant 0 : index
    %c0_0 = arith.constant 0 : index
    %0 = vector.load %arg0[%c0, %c0_0] : memref<32x128xf32, #tpu.memory_space<vmem>>, vector<32x128xf32>
    %c0_1 = arith.constant 0 : index
    %c0_2 = arith.constant 0 : index
    %1 = vector.load %arg7[%c0_1, %c0_2] : memref<128x128xf32, #tpu.memory_space<vmem>>, vector<128x128xf32>
    %2 = tpu.iota {dimensions = array<i32: 0>} : vector<32x128xi32>
    %c16_i32 = arith.constant 16 : i32
    %c0_i32 = arith.constant 0 : i32
    %3 = arith.cmpi eq, %c16_i32, %c0_i32 : i32
    %c1_i32 = arith.constant 1 : i32
    %4 = arith.select %3, %c1_i32, %c16_i32 : i32
    %5 = vector.broadcast %4 : i32 to vector<32x128xi32>
    %6 = arith.remsi %2, %5 : vector<32x128xi32>
    %c0_i32_3 = arith.constant 0 : i32
    %7 = vector.broadcast %c0_i32_3 : i32 to vector<32x128xi32>
    %8 = arith.cmpi ne, %6, %7 : vector<32x128xi32>
    %c0_i32_4 = arith.constant 0 : i32
    %9 = vector.broadcast %c0_i32_4 : i32 to vector<32x128xi32>
    %10 = arith.cmpi slt, %6, %9 : vector<32x128xi32>
    %c0_i32_5 = arith.constant 0 : i32
    %11 = arith.cmpi slt, %4, %c0_i32_5 : i32
    %12 = vector.broadcast %11 : i1 to vector<32x128xi1>
    %13 = vector.broadcast %12 : vector<32x128xi1> to vector<32x128xi1>
    %14 = arith.xori %10, %13 : vector<32x128xi1>
    %15 = arith.andi %14, %8 : vector<32x128xi1>
    %16 = vector.broadcast %4 : i32 to vector<32x128xi32>
    %17 = arith.addi %6, %16 : vector<32x128xi32>
    %18 = arith.select %15, %17, %6 : vector<32x128xi1>, vector<32x128xi32>
    %c0_i32_6 = arith.constant 0 : i32
    %19 = vector.broadcast %c0_i32_6 : i32 to vector<32x128xi32>
    %20 = arith.cmpi ne, %18, %19 : vector<32x128xi32>
    %c15_i32 = arith.constant 15 : i32
    %21 = vector.broadcast %c15_i32 : i32 to vector<32x128xi32>
    %22 = arith.cmpi ne, %18, %21 : vector<32x128xi32>
    %c1_i32_7 = arith.constant 1 : i32
    %23 = tpu.dynamic_rotate %0 by %c1_i32_7 dim 0 : vector<32x128xf32>, i32 -> vector<32x128xf32>
    %cst = arith.constant 0.000000e+00 : f32
    %24 = vector.broadcast %cst : f32 to vector<32x128xf32>
    %25 = arith.select %20, %23, %24 : vector<32x128xi1>, vector<32x128xf32>
    %c31_i32 = arith.constant 31 : i32
    %26 = tpu.dynamic_rotate %0 by %c31_i32 dim 0 : vector<32x128xf32>, i32 -> vector<32x128xf32>
    %cst_8 = arith.constant 0.000000e+00 : f32
    %27 = vector.broadcast %cst_8 : f32 to vector<32x128xf32>
    %28 = arith.select %22, %26, %27 : vector<32x128xi1>, vector<32x128xf32>
    %29 = arith.truncf %25 : vector<32x128xf32> to vector<32x128xbf16>
    %c0_9 = arith.constant 0 : index
    %c0_10 = arith.constant 0 : index
    %c0_11 = arith.constant 0 : index
    %30 = vector.load %arg1[%c0_9, %c0_10, %c0_11] : memref<3x128x128xbf16, #tpu.memory_space<vmem>>, vector<1x128x128xbf16>
    %31 = vector.shape_cast %30 : vector<1x128x128xbf16> to vector<128x128xbf16>
    %cst_12 = arith.constant dense<0.000000e+00> : vector<32x128xf32>
    %32 = tpu.matmul %29, %31, %cst_12 {dimension_numbers = #tpu.dot_dimension_numbers<[1], [0], [0], [1], [0, 0, 1, 1], [], []>} : vector<32x128xbf16>, vector<128x128xbf16>, vector<32x128xf32> -> vector<32x128xf32>
    %33 = arith.truncf %0 : vector<32x128xf32> to vector<32x128xbf16>
    %c1 = arith.constant 1 : index
    %c0_13 = arith.constant 0 : index
    %c0_14 = arith.constant 0 : index
    %34 = vector.load %arg1[%c1, %c0_13, %c0_14] : memref<3x128x128xbf16, #tpu.memory_space<vmem>>, vector<1x128x128xbf16>
    %35 = vector.shape_cast %34 : vector<1x128x128xbf16> to vector<128x128xbf16>
    %cst_15 = arith.constant dense<0.000000e+00> : vector<32x128xf32>
    %36 = tpu.matmul %33, %35, %cst_15 {dimension_numbers = #tpu.dot_dimension_numbers<[1], [0], [0], [1], [0, 0, 1, 1], [], []>} : vector<32x128xbf16>, vector<128x128xbf16>, vector<32x128xf32> -> vector<32x128xf32>
    %37 = arith.addf %32, %36 : vector<32x128xf32>
    %38 = arith.truncf %28 : vector<32x128xf32> to vector<32x128xbf16>
    %c2 = arith.constant 2 : index
    %c0_16 = arith.constant 0 : index
    %c0_17 = arith.constant 0 : index
    %39 = vector.load %arg1[%c2, %c0_16, %c0_17] : memref<3x128x128xbf16, #tpu.memory_space<vmem>>, vector<1x128x128xbf16>
    %40 = vector.shape_cast %39 : vector<1x128x128xbf16> to vector<128x128xbf16>
    %cst_18 = arith.constant dense<0.000000e+00> : vector<32x128xf32>
    %41 = tpu.matmul %38, %40, %cst_18 {dimension_numbers = #tpu.dot_dimension_numbers<[1], [0], [0], [1], [0, 0, 1, 1], [], []>} : vector<32x128xbf16>, vector<128x128xbf16>, vector<32x128xf32> -> vector<32x128xf32>
    %42 = arith.addf %37, %41 : vector<32x128xf32>
    %cst_19 = arith.constant dense<0.000000e+00> : vector<128xf32>
    %43 = vector.multi_reduction <add>, %42, %cst_19 [0] : vector<32x128xf32> to vector<128xf32>
    %44 = vector.shape_cast %43 : vector<128xf32> to vector<1x128xf32>
    %45 = arith.mulf %42, %42 : vector<32x128xf32>
    %cst_20 = arith.constant dense<0.000000e+00> : vector<128xf32>
    %46 = vector.multi_reduction <add>, %45, %cst_20 [0] : vector<32x128xf32> to vector<128xf32>
    %47 = vector.shape_cast %46 : vector<128xf32> to vector<1x128xf32>
    %cst_21 = arith.constant dense<0.000000e+00> : vector<1x128xf32>
    %48 = tpu.matmul %44, %1, %cst_21 {dimension_numbers = #tpu.dot_dimension_numbers<[1], [0], [0], [1], [0, 0, 1, 1], [], []>} : vector<1x128xf32>, vector<128x128xf32>, vector<1x128xf32> -> vector<1x128xf32>
    %cst_22 = arith.constant 0.001953125 : f32
    %49 = vector.broadcast %cst_22 : f32 to vector<1x128xf32>
    %50 = arith.mulf %48, %49 : vector<1x128xf32>
    %cst_23 = arith.constant dense<0.000000e+00> : vector<1x128xf32>
    %51 = tpu.matmul %47, %1, %cst_23 {dimension_numbers = #tpu.dot_dimension_numbers<[1], [0], [0], [1], [0, 0, 1, 1], [], []>} : vector<1x128xf32>, vector<128x128xf32>, vector<1x128xf32> -> vector<1x128xf32>
    %cst_24 = arith.constant 0.001953125 : f32
    %52 = vector.broadcast %cst_24 : f32 to vector<1x128xf32>
    %53 = arith.mulf %51, %52 : vector<1x128xf32>
    %54 = arith.mulf %50, %50 : vector<1x128xf32>
    %55 = arith.subf %53, %54 : vector<1x128xf32>
    %56 = vector.broadcast %50 : vector<1x128xf32> to vector<32x128xf32>
    %57 = arith.subf %42, %56 : vector<32x128xf32>
    %cst_25 = arith.constant 9.99999974E-6 : f32
    %58 = vector.broadcast %cst_25 : f32 to vector<1x128xf32>
    %59 = arith.addf %55, %58 : vector<1x128xf32>
    %60 = math.rsqrt %59 : vector<1x128xf32>
    %61 = vector.broadcast %60 : vector<1x128xf32> to vector<32x128xf32>
    %62 = arith.mulf %57, %61 : vector<32x128xf32>
    %c0_26 = arith.constant 0 : index
    %c0_27 = arith.constant 0 : index
    %63 = vector.load %arg3[%c0_26, %c0_27] : memref<1x128xf32, #tpu.memory_space<vmem>>, vector<1x128xf32>
    %64 = vector.broadcast %63 : vector<1x128xf32> to vector<32x128xf32>
    %65 = arith.mulf %62, %64 : vector<32x128xf32>
    %c0_28 = arith.constant 0 : index
    %c0_29 = arith.constant 0 : index
    %66 = vector.load %arg4[%c0_28, %c0_29] : memref<1x128xf32, #tpu.memory_space<vmem>>, vector<1x128xf32>
    %67 = vector.broadcast %66 : vector<1x128xf32> to vector<32x128xf32>
    %68 = arith.addf %65, %67 : vector<32x128xf32>
    %cst_30 = arith.constant 0.000000e+00 : f32
    %69 = vector.broadcast %cst_30 : f32 to vector<32x128xf32>
    %70 = arith.maximumf %68, %69 : vector<32x128xf32>
    %c1_i32_31 = arith.constant 1 : i32
    %71 = tpu.dynamic_rotate %70 by %c1_i32_31 dim 0 : vector<32x128xf32>, i32 -> vector<32x128xf32>
    %cst_32 = arith.constant 0.000000e+00 : f32
    %72 = vector.broadcast %cst_32 : f32 to vector<32x128xf32>
    %73 = arith.select %20, %71, %72 : vector<32x128xi1>, vector<32x128xf32>
    %c31_i32_33 = arith.constant 31 : i32
    %74 = tpu.dynamic_rotate %70 by %c31_i32_33 dim 0 : vector<32x128xf32>, i32 -> vector<32x128xf32>
    %cst_34 = arith.constant 0.000000e+00 : f32
    %75 = vector.broadcast %cst_34 : f32 to vector<32x128xf32>
    %76 = arith.select %22, %74, %75 : vector<32x128xi1>, vector<32x128xf32>
    %77 = arith.truncf %73 : vector<32x128xf32> to vector<32x128xbf16>
    %c0_35 = arith.constant 0 : index
    %c0_36 = arith.constant 0 : index
    %c0_37 = arith.constant 0 : index
    %78 = vector.load %arg2[%c0_35, %c0_36, %c0_37] : memref<3x128x128xbf16, #tpu.memory_space<vmem>>, vector<1x128x128xbf16>
    %79 = vector.shape_cast %78 : vector<1x128x128xbf16> to vector<128x128xbf16>
    %cst_38 = arith.constant dense<0.000000e+00> : vector<32x128xf32>
    %80 = tpu.matmul %77, %79, %cst_38 {dimension_numbers = #tpu.dot_dimension_numbers<[1], [0], [0], [1], [0, 0, 1, 1], [], []>} : vector<32x128xbf16>, vector<128x128xbf16>, vector<32x128xf32> -> vector<32x128xf32>
    %81 = arith.truncf %70 : vector<32x128xf32> to vector<32x128xbf16>
    %c1_39 = arith.constant 1 : index
    %c0_40 = arith.constant 0 : index
    %c0_41 = arith.constant 0 : index
    %82 = vector.load %arg2[%c1_39, %c0_40, %c0_41] : memref<3x128x128xbf16, #tpu.memory_space<vmem>>, vector<1x128x128xbf16>
    %83 = vector.shape_cast %82 : vector<1x128x128xbf16> to vector<128x128xbf16>
    %cst_42 = arith.constant dense<0.000000e+00> : vector<32x128xf32>
    %84 = tpu.matmul %81, %83, %cst_42 {dimension_numbers = #tpu.dot_dimension_numbers<[1], [0], [0], [1], [0, 0, 1, 1], [], []>} : vector<32x128xbf16>, vector<128x128xbf16>, vector<32x128xf32> -> vector<32x128xf32>
    %85 = arith.addf %80, %84 : vector<32x128xf32>
    %86 = arith.truncf %76 : vector<32x128xf32> to vector<32x128xbf16>
    %c2_43 = arith.constant 2 : index
    %c0_44 = arith.constant 0 : index
    %c0_45 = arith.constant 0 : index
    %87 = vector.load %arg2[%c2_43, %c0_44, %c0_45] : memref<3x128x128xbf16, #tpu.memory_space<vmem>>, vector<1x128x128xbf16>
    %88 = vector.shape_cast %87 : vector<1x128x128xbf16> to vector<128x128xbf16>
    %cst_46 = arith.constant dense<0.000000e+00> : vector<32x128xf32>
    %89 = tpu.matmul %86, %88, %cst_46 {dimension_numbers = #tpu.dot_dimension_numbers<[1], [0], [0], [1], [0, 0, 1, 1], [], []>} : vector<32x128xbf16>, vector<128x128xbf16>, vector<32x128xf32> -> vector<32x128xf32>
    %90 = arith.addf %85, %89 : vector<32x128xf32>
    %cst_47 = arith.constant dense<0.000000e+00> : vector<128xf32>
    %91 = vector.multi_reduction <add>, %90, %cst_47 [0] : vector<32x128xf32> to vector<128xf32>
    %92 = vector.shape_cast %91 : vector<128xf32> to vector<1x128xf32>
    %93 = arith.mulf %90, %90 : vector<32x128xf32>
    %cst_48 = arith.constant dense<0.000000e+00> : vector<128xf32>
    %94 = vector.multi_reduction <add>, %93, %cst_48 [0] : vector<32x128xf32> to vector<128xf32>
    %95 = vector.shape_cast %94 : vector<128xf32> to vector<1x128xf32>
    %cst_49 = arith.constant dense<0.000000e+00> : vector<1x128xf32>
    %96 = tpu.matmul %92, %1, %cst_49 {dimension_numbers = #tpu.dot_dimension_numbers<[1], [0], [0], [1], [0, 0, 1, 1], [], []>} : vector<1x128xf32>, vector<128x128xf32>, vector<1x128xf32> -> vector<1x128xf32>
    %cst_50 = arith.constant 0.001953125 : f32
    %97 = vector.broadcast %cst_50 : f32 to vector<1x128xf32>
    %98 = arith.mulf %96, %97 : vector<1x128xf32>
    %cst_51 = arith.constant dense<0.000000e+00> : vector<1x128xf32>
    %99 = tpu.matmul %95, %1, %cst_51 {dimension_numbers = #tpu.dot_dimension_numbers<[1], [0], [0], [1], [0, 0, 1, 1], [], []>} : vector<1x128xf32>, vector<128x128xf32>, vector<1x128xf32> -> vector<1x128xf32>
    %cst_52 = arith.constant 0.001953125 : f32
    %100 = vector.broadcast %cst_52 : f32 to vector<1x128xf32>
    %101 = arith.mulf %99, %100 : vector<1x128xf32>
    %102 = arith.mulf %98, %98 : vector<1x128xf32>
    %103 = arith.subf %101, %102 : vector<1x128xf32>
    %104 = vector.broadcast %98 : vector<1x128xf32> to vector<32x128xf32>
    %105 = arith.subf %90, %104 : vector<32x128xf32>
    %cst_53 = arith.constant 9.99999974E-6 : f32
    %106 = vector.broadcast %cst_53 : f32 to vector<1x128xf32>
    %107 = arith.addf %103, %106 : vector<1x128xf32>
    %108 = math.rsqrt %107 : vector<1x128xf32>
    %109 = vector.broadcast %108 : vector<1x128xf32> to vector<32x128xf32>
    %110 = arith.mulf %105, %109 : vector<32x128xf32>
    %c0_54 = arith.constant 0 : index
    %c0_55 = arith.constant 0 : index
    %111 = vector.load %arg5[%c0_54, %c0_55] : memref<1x128xf32, #tpu.memory_space<vmem>>, vector<1x128xf32>
    %112 = vector.broadcast %111 : vector<1x128xf32> to vector<32x128xf32>
    %113 = arith.mulf %110, %112 : vector<32x128xf32>
    %c0_56 = arith.constant 0 : index
    %c0_57 = arith.constant 0 : index
    %114 = vector.load %arg6[%c0_56, %c0_57] : memref<1x128xf32, #tpu.memory_space<vmem>>, vector<1x128xf32>
    %115 = vector.broadcast %114 : vector<1x128xf32> to vector<32x128xf32>
    %116 = arith.addf %113, %115 : vector<32x128xf32>
    %117 = arith.addf %116, %0 : vector<32x128xf32>
    %cst_58 = arith.constant 0.000000e+00 : f32
    %118 = vector.broadcast %cst_58 : f32 to vector<32x128xf32>
    %119 = arith.maximumf %117, %118 : vector<32x128xf32>
    %c0_59 = arith.constant 0 : index
    %c0_60 = arith.constant 0 : index
    %120 = vector.load %arg8[%c0_59, %c0_60] : memref<32x128xf32, #tpu.memory_space<vmem>>, vector<32x128xf32>
    tpu.vector_store %arg8[%c0_59, %c0_60], %119 {strides = array<i32>} : memref<32x128xf32, #tpu.memory_space<vmem>>, vector<32x128xf32>,
    return
  }
}

</mosaic_0001>

<bundles_post_ra>
// kernel: tpu_custom_call.1
= control target key start
LH: loop header
LB: loop body
LE: loop exit
PB: predicated region body
PF: predicated region fallthrough
CT: control target
= control target key end

     0   :  { %13 = vsyncpa [#allocation3], 0  ;;  %s2415_s0 = inlined_call_operand.hbm [shape: f32[32,128], index: 0, kind: input, shape index: {}]   ;;  %s2416_s1 = inlined_call_operand.hbm [shape: bf16[3,128,128], index: 1, kind: input, shape index: {}]   ;;  %s2417_s2 = inlined_call_operand.hbm [shape: bf16[3,128,128], index: 2, kind: input, shape index: {}]   ;;  %s2418_s3 = inlined_call_operand.vmem [shape: f32[1,128], index: 3, kind: input, shape index: {}]   ;;  %s2419_s4 = inlined_call_operand.vmem [shape: f32[1,128], index: 4, kind: input, shape index: {}]   ;;  %s2420_s5 = inlined_call_operand.vmem [shape: f32[1,128], index: 5, kind: input, shape index: {}]   ;;  %s2421_s6 = inlined_call_operand.vmem [shape: f32[1,128], index: 6, kind: input, shape index: {}]   ;;  %s2422_s7 = inlined_call_operand.hbm [shape: f32[128,128], index: 7, kind: input, shape index: {}]   ;;  %s2423_s8 = inlined_call_operand.hbm [shape: f32[32,128], index: 8, kind: output, shape index: {}]  }
   0x1   :  { %14 = vsyncpa [#allocation6], 0 }
   0x2   :  { %15 = vsyncpa [#allocation9], 0 }
   0x3   :  { %16 = vsyncpa [#allocation4], 0  ;;  %s2006_s27 = smov [#allocation5]  }
   0x4   :  { %s34_s28 = sshll.u32 %s2006_s27, 4  ;;  %s35_s28 = int_to_ptr.vmem [resolvable:$true] %s34_s28 }
   0x5   :  { %s1906_s29 = scalar_lea.vmem %s35_s28, 3072  ;;  %p1911_p1 = scmp.lt.s32.totalorder %s35_s28, %s35_s28 }
   0x6   :  { %p1907_p0 = scmp.ne.s32.totalorder %s35_s28, %s1906_s29  ;;  %p1912_p2 = scmp.lt.s32.totalorder %s1906_s29, %s1906_s29 }
   0x8   :  { %p1913_p3 = por %p1912_p2, %p1911_p1 }
   0xa   :  { %p1914_p4 = pnand %p1913_p3, %p1907_p0 }
   0xc   :  { %1917 = shalt.err (!%p1914_p4)
}
   0xd   :  { %s2007_s30 = smov 64   ;;  %s2008_s9 = smov 4  }
   0xe   :  { %40 = dma.hbm_to_vmem [thread:$0]  %s2416_s1, 3072, %s35_s28, [#allocation6], %s2007_s30, %s2007_s30, %s2008_s9  }
   0xf   :  { %s2009_s12 = smov [#allocation2]  }
  0x10   :  { %s22_s13 = sshll.u32 %s2009_s12, 4  ;;  %s23_s13 = int_to_ptr.vmem [resolvable:$true] %s22_s13 }
  0x11   :  { %s1926_s14 = scalar_lea.vmem %s23_s13, 512  ;;  %p1931_p6 = scmp.lt.s32.totalorder %s23_s13, %s23_s13 }
  0x12   :  { %p1927_p5 = scmp.ne.s32.totalorder %s23_s13, %s1926_s14  ;;  %p1932_p7 = scmp.lt.s32.totalorder %s1926_s14, %s1926_s14 }
  0x14   :  { %p1933_p8 = por %p1932_p7, %p1931_p6 }
  0x16   :  { %p1934_p9 = pnand %p1933_p8, %p1927_p5 }
  0x18   :  { %1937 = shalt.err (!%p1934_p9)
}
  0x19   :  { %s2010_s15 = smov 128   ;;  %s2011_s16 = smov 8  }
  0x1a   :  { %28 = dma.hbm_to_vmem [thread:$0]  %s2415_s0, 512, %s23_s13, [#allocation3], %s2010_s15, %s2010_s15, %s2011_s16  }
  0x1b   :  { %s2012_s1 = smov [#allocation7]   ;;  %s2013_s20 = smov [#allocation8]  }
  0x1c   :  { %s46_s19 = sshll.u32 %s2012_s1, 4  ;;  %s66_s21 = sshll.u32 %s2013_s20, 4  ;;  %s47_s19 = int_to_ptr.vmem [resolvable:$true] %s46_s19  ;;  %s67_s21 = int_to_ptr.vmem [resolvable:$true] %s66_s21 }
  0x1d   :  { %s1946_s22 = scalar_lea.vmem %s47_s19, 3072  ;;  %p1951_p11 = scmp.lt.s32.totalorder %s47_s19, %s47_s19 }
  0x1e   :  { %p1947_p10 = scmp.ne.s32.totalorder %s47_s19, %s1946_s22  ;;  %p1952_p12 = scmp.lt.s32.totalorder %s1946_s22, %s1946_s22 }
  0x20   :  { %p1953_p13 = por %p1952_p12, %p1951_p11 }
  0x22   :  { %p1954_p0 = pnand %p1953_p13, %p1947_p10 }
  0x24   :  { %1957 = shalt.err (!%p1954_p0)
}
  0x25   :  { %52 = dma.hbm_to_vmem [thread:$0]  %s2417_s2, 3072, %s47_s19, [#allocation6], %s2007_s30, %s2007_s30, %s2008_s9  }
  0x26   :  { %s1966_s0 = scalar_lea.vmem %s67_s21, 2048  ;;  %p1971_p2 = scmp.lt.s32.totalorder %s67_s21, %s67_s21 }
  0x27   :  { %p1967_p1 = scmp.ne.s32.totalorder %s67_s21, %s1966_s0  ;;  %p1972_p3 = scmp.lt.s32.totalorder %s1966_s0, %s1966_s0 }
  0x29   :  { %p1973_p4 = por %p1972_p3, %p1971_p2 }
  0x2b   :  { %p1974_p5 = pnand %p1973_p4, %p1967_p1 }
  0x2d   :  { %1977 = shalt.err (!%p1974_p5)
}
  0x2e   :  { %72 = dma.hbm_to_vmem [thread:$0]  %s2422_s7, 2048, %s67_s21, [#allocation9], %s2010_s15, %s2010_s15, %s2011_s16  }
  0x2f   :  { %1998 = dma.done.wait [#allocation3], 512  }
  0x30   :  { %1999 = vsyncadd [#allocation3], 4294966784 }
  0x31   :  { %2000 = dma.done.wait [#allocation6], 6144  }
  0x32   :  { %2001 = vsyncadd [#allocation6], 4294961152 }
  0x33   :  { %2002 = dma.done.wait [#allocation9], 2048  }
  0x34   :  { %2003 = vsyncadd [#allocation9], 4294965248  ;;  %v1842_v0 = vld [vmem:[#allocation5 + $0x78] sm:$0xff]   ;;  %v1844_v2 = vld [vmem:[#allocation5 + $0x70] sm:$0xff]   ;;  %v106_v6 = vlaneseq  ;;  %vm2014_vm2 = vmmov 1   ;;  %vm2016_vm11 = vmmov 0  }
  0x35   :  { %v1843_v1 = vld [vmem:[#allocation5 + $0x38] sm:$0xff]   ;;  %1570 = vmatprep.subr.bf16.mxu0 %v1842_v0  ;;  %v1845_v3 = vld [vmem:[#allocation5 + $0x30] sm:$0xff]   ;;  %v1846_v4 = vld [vmem:[#allocation5 + $0x68] sm:$0xff]   ;;  %s2017_s9 = smov [#allocation10]  }
  0x36   :  { %1590 = vmatprep.subr.bf16.mxu1 %v1843_v1  ;;  %1571 = vmatpush3.bf16.msra.mxu0 %v1842_v0  ;;  %v1847_v5 = vld [vmem:[#allocation5 + $0x28] sm:$0xff]   ;;  %v1848_v7 = vld [vmem:[#allocation5 + $0x60] sm:$0xff]   ;;  %v2087_v9 = vshrl.u32 %v106_v6, 7  ;;  %v1850_v10 = vld [vmem:[#allocation5 + $0x58] sm:$0xff]   ;;  %s1352_s10 = sshll.u32 %s2017_s9, 4  ;;  %s1353_s10 = int_to_ptr.vmem [resolvable:$true] %s1352_s10 }
  0x37   :  { %1591 = vmatpush3.bf16.msra.mxu1 %v1843_v1  ;;  %1572 = vmatprep.subr.bf16.mxu0 %v1844_v2  ;;  %v1849_v8 = vld [vmem:[#allocation5 + $0x20] sm:$0xff]   ;;  %v1851_v11 = vld [vmem:[#allocation5 + $0x18] sm:$0xff]   ;;  %v1852_v14 = vld [vmem:[#allocation5 + $0x50] sm:$0xff]   ;;  %v2015_v1 = vmov 0.0   ;;  %p1983_p7 = scmp.lt.s32.totalorder %s1353_s10, %s1353_s10 }
  0x38   :  { %1592 = vmatprep.subr.bf16.mxu1 %v1845_v3  ;;  %v115_v12 = vand.u32 15, %v2087_v9  ;;  %v109_v13 = vadd.s32 16, %v2087_v9  ;;  %v108_v15 = vadd.s32 8, %v2087_v9  ;;  %v2092_v16 = vld [vmem:[#allocation2] sm:$0xff]  ;;  %v87_v17 = vld [vmem:[#allocation2 + $0x8] sm:$0xff]  ;;  %v2094_v18 = vld [vmem:[#allocation2 + $0x18] sm:$0xff] }
  0x39   :  { %v1853_v19 = vld [vmem:[#allocation5 + $0x10] sm:$0xff]   ;;  %v211_v20 = vpack.c.bf16 %v87_v17, %v2092_v16  ;;  %v167_v22 = vrot.slane %v2092_v16, 7  ;;  %vm171_vm1 = vcmp.lt.s32.totalorder %v2087_v9, 1  ;;  %v1854_v23 = vld [vmem:[#allocation5 + $0x48] sm:$0xff]   ;;  %v168_v24 = vrot.slane %v87_v17, 7  ;;  %v1856_v34 = vld [vmem:[#allocation5 + $0x40] sm:$0xff]  }
  0x3a   :  { %1573 = vmatpush3.bf16.msra.mxu0 %v1844_v2  ;;  %vm2097_vm0 = vcmp.ne.s32.totalorder %v115_v12, 0  ;;  %v170_v25 = vrot.slane %v2094_v18, 7  ;;  %v129_v26 = vand.u32 15, %v109_v13  ;;  %v1855_v27 = vld [vmem:[#allocation5 + $0x8] sm:$0xff]   ;;  %v122_v28 = vand.u32 15, %v108_v15  ;;  %v88_v33 = vld [vmem:[#allocation2 + $0x10] sm:$0xff] }
  0x3b   :  { %1593 = vmatpush3.bf16.msra.mxu1 %v1845_v3  ;;  %1574 = vmatprep.subr.bf16.mxu0 %v1846_v4  ;;  %v174_v29 = vsel %vm171_vm1, %v167_v22, %v168_v24  ;;  %vm2111_vm3 = vmpackc.low %vm2014_vm2, %vm2097_vm0  ;;  %v1857_v35 = vld [vmem:[#allocation5] sm:$0xff]   ;;  %v180_v36 = vrot.slane %v2092_v16, 1  ;;  %v169_v37 = vrot.slane %v88_v33, 7  ;;  %v181_v38 = vrot.slane %v87_v17, 1  ;;  %v1858_v41 = vld [vmem:[#allocation5 + $0xb8] sm:$0xff]  }
  0x3c   :  { %1594 = vmatprep.subr.bf16.mxu1 %v1847_v5  ;;  %1586 = vmatprep.mubr.bf16.mxu0 %v211_v20  ;;  %v175_v30 = vsel %vm171_vm1, %v170_v25, %v167_v22  ;;  %vm161_vm4 = vcmp.ne.s32.totalorder %v129_v26, 0  ;;  %vm164_vm5 = vcmp.ne.s32.totalorder %v122_v28, 15  ;;  %v182_v39 = vrot.slane %v88_v33, 1  ;;  %v1859_v48 = vld [vmem:[#allocation5 + $0xb0] sm:$0xff]   ;;  %v1860_v51 = vld [vmem:[#allocation5 + $0xa8] sm:$0xff]   ;;  %v1861_v52 = vld [vmem:[#allocation5 + $0xa0] sm:$0xff]  }
  0x3d   :  { %v1383_v32 = vpack.c.bf16 %v174_v29, %v175_v30  ;;  %vm2119_vm6 = vmpackc.low %vm2014_vm2, %vm161_vm4  ;;  %vm184_vm7 = vcmp.lt.s32.totalorder %v2087_v9, 7  ;;  %v172_v43 = vsel %vm171_vm1, %v169_v37, %v170_v25  ;;  %v173_v44 = vsel %vm171_vm1, %v168_v24, %v169_v37  ;;  %v1862_v53 = vld [vmem:[#allocation5 + $0x98] sm:$0xff]   ;;  %v1863_v54 = vld [vmem:[#allocation5 + $0x90] sm:$0xff]  }
  0x3e   :  { %1575 = vmatpush3.bf16.msra.mxu0 %v1846_v4  ;;  %vm2125_vm8 = vmpackc.low %vm164_vm5, %vm2014_vm2  ;;  %v186_v45 = vsel %vm184_vm7, %v181_v38, %v182_v39  ;;  %v187_v46 = vsel %vm184_vm7, %v180_v36, %v181_v38  ;;  %v212_v47 = vpack.c.bf16 %v2094_v18, %v88_v33  ;;  %v1386_v49 = vpack.c.bf16 %v172_v43, %v173_v44  ;;  %v1864_v55 = vld [vmem:[#allocation5 + $0x88] sm:$0xff]   ;;  %v1865_v58 = vld [vmem:[#allocation5 + $0x80] sm:$0xff]  }
  0x3f   :  { %1595 = vmatpush3.bf16.msra.mxu1 %v1847_v5  ;;  %1576 = vmatprep.subr.bf16.mxu0 %v1848_v7  ;;  %v1397_v50 = vpack.c.bf16 %v186_v45, %v187_v46  ;;  %v110_v56 = vadd.s32 24, %v2087_v9  ;;  %v183_v57 = vrot.slane %v2094_v18, 1  ;;  %v2155_v0 = vld [vmem:[#allocation8 + $0x78] sm:$0xff]  ;;  %v2159_v2 = vld [vmem:[#allocation8 + $0x70] sm:$0xff]  ;;  %v2169_v3 = vld [vmem:[#allocation8 + $0x68] sm:$0xff] }
  0x40   :  { %1596 = vmatprep.subr.bf16.mxu1 %v1849_v8  ;;  %1606 = vmatprep.mubr.msk.bf16.mxu1 %vm2111_vm3, %v1383_v32  ;;  %v2174_v4 = vld [vmem:[#allocation8 + $0x60] sm:$0xff]  ;;  %v2180_v5 = vld [vmem:[#allocation8 + $0x58] sm:$0xff]  ;;  %v2186_v6 = vld [vmem:[#allocation8 + $0x50] sm:$0xff] }
  0x41   :  { %v136_v59 = vand.u32 15, %v110_v56  ;;  %v185_v60 = vsel %vm184_vm7, %v182_v39, %v183_v57  ;;  %v188_v61 = vsel %vm184_vm7, %v183_v57, %v180_v36  ;;  %v2216_v12 = vld [vmem:[#allocation8 + $0x28] sm:$0xff]  ;;  %v2220_v13 = vld [vmem:[#allocation8 + $0x20] sm:$0xff]  ;;  %v2231_v15 = vld [vmem:[#allocation8 + $0x10] sm:$0xff] }
  0x42   :  { %1577 = vmatpush3.bf16.msra.mxu0 %v1848_v7  ;;  %v1400_v62 = vpack.c.bf16 %v188_v61, %v185_v60  ;;  %v2192_v7 = vld [vmem:[#allocation8 + $0x48] sm:$0xff]  ;;  %v2243_v17 = vld [vmem:[#allocation8] sm:$0xff]  ;;  %v1886_v31 = vld [vmem:[#allocation7 + $0x98] sm:$0xff]  }
  0x43   :  { %1597 = vmatpush3.bf16.msra.mxu1 %v1849_v8  ;;  %1578 = vmatprep.subr.bf16.mxu0 %v1850_v10  ;;  %vm166_vm9 = vcmp.ne.s32.totalorder %v136_v59, 15  ;;  %v2198_v8 = vld [vmem:[#allocation8 + $0x40] sm:$0xff]  ;;  %v2237_v16 = vld [vmem:[#allocation8 + $0x8] sm:$0xff]  ;;  %v1887_v40 = vld [vmem:[#allocation7 + $0x90] sm:$0xff]  }
  0x44   :  { %1598 = vmatprep.subr.bf16.mxu1 %v1851_v11  ;;  %vm2149_vm10 = vmpackc.low %vm166_vm9, %vm2014_vm2  ;;  %v1888_v42 = vld [vmem:[#allocation7 + $0x88] sm:$0xff]  }
  0x46   :  { %1579 = vmatpush3.bf16.msra.mxu0 %v1850_v10  ;;  %v2204_v10 = vld [vmem:[#allocation8 + $0x38] sm:$0xff] }
  0x47   :  { %1599 = vmatpush3.bf16.msra.mxu1 %v1851_v11  ;;  %1580 = vmatprep.subr.bf16.mxu0 %v1852_v14  ;;  %v2210_v11 = vld [vmem:[#allocation8 + $0x30] sm:$0xff] }
  0x48   :  { %1600 = vmatprep.subr.bf16.mxu1 %v1853_v19 }
  0x4a   :  { %1581 = vmatpush3.bf16.msra.mxu0 %v1852_v14  ;;  %v2225_v14 = vld [vmem:[#allocation8 + $0x18] sm:$0xff] }
  0x4b   :  { %1601 = vmatpush3.bf16.msra.mxu1 %v1853_v19  ;;  %1582 = vmatprep.subr.bf16.mxu0 %v1854_v23 }
  0x4c   :  { %1602 = vmatprep.subr.bf16.mxu1 %v1855_v27 }
  0x4e   :  { %1583 = vmatpush3.bf16.msra.mxu0 %v1854_v23 }
  0x4f   :  { %1603 = vmatpush3.bf16.msra.mxu1 %v1855_v27  ;;  %1584 = vmatprep.subr.bf16.mxu0 %v1856_v34 }
  0x50   :  { %1604 = vmatprep.subr.bf16.mxu1 %v1857_v35 }
  0x52   :  { %1585 = vmatpush3.bf16.msra.mxu0 %v1856_v34 }
  0x53   :  { %1605 = vmatpush3.bf16.msra.mxu1 %v1857_v35  ;;  %1610 = vmatprep.subr.bf16.mxu0 %v1858_v41 }
  0x54   :  { %1630 = vmatprep.subr.mxu1 %v2015_v1 }
  0x55   :  { %1587 = vmatmul.mubr.bf16.vlgmr.msra.gmra.mxu0 %v212_v47 }
  0x56   :  { %1607 = vmatmul.mubr.msk.bf16.vlgmr.msra.gmra.mxu1 %vm2119_vm6, %v1386_v49  ;;  %1611 = vmatpush3.bf16.msra.mxu0 %v1858_v41 }
  0x57   :  { %1612 = vmatprep.subr.bf16.mxu0 %v1859_v48  ;;  %1626 = vmatprep.mubr.msk.bf16.mxu0 %vm2125_vm8, %v1397_v50 }
  0x58   :  { %1631 = vmatpush3.msra.mxu1 %v2155_v0  ;;  %1662 = vmatprep.mubr.msk.f32.mxu1 %vm2016_vm11, %v2015_v1 }
  0x59   :  { %1632 = vmatprep.subr.mxu1 %v2015_v1 }
  0x5a   :  { %1613 = vmatpush3.bf16.msra.mxu0 %v1859_v48  ;;  %1633 = vmatpush3.msra.mxu1 %v2159_v2 }
  0x5b   :  { %1614 = vmatprep.subr.bf16.mxu0 %v1860_v51  ;;  %1634 = vmatprep.subr.mxu1 %v2015_v1 }
  0x5c   :  { %1635 = vmatpush3.msra.mxu1 %v2169_v3 }
  0x5d   :  { %1636 = vmatprep.subr.mxu1 %v2015_v1 }
  0x5e   :  { %1615 = vmatpush3.bf16.msra.mxu0 %v1860_v51  ;;  %1637 = vmatpush3.msra.mxu1 %v2174_v4 }
  0x5f   :  { %1616 = vmatprep.subr.bf16.mxu0 %v1861_v52  ;;  %1638 = vmatprep.subr.mxu1 %v2015_v1 }
  0x60   :  { %1639 = vmatpush3.msra.mxu1 %v2180_v5 }
  0x61   :  { %1640 = vmatprep.subr.mxu1 %v2015_v1 }
  0x62   :  { %1617 = vmatpush3.bf16.msra.mxu0 %v1861_v52  ;;  %1641 = vmatpush3.msra.mxu1 %v2186_v6 }
  0x63   :  { %1618 = vmatprep.subr.bf16.mxu0 %v1862_v53  ;;  %1642 = vmatprep.subr.mxu1 %v2015_v1 }
  0x64   :  { %1643 = vmatpush3.msra.mxu1 %v2192_v7 }
  0x65   :  { %1644 = vmatprep.subr.mxu1 %v2015_v1 }
  0x66   :  { %1619 = vmatpush3.bf16.msra.mxu0 %v1862_v53  ;;  %1645 = vmatpush3.msra.mxu1 %v2198_v8 }
  0x67   :  { %1620 = vmatprep.subr.bf16.mxu0 %v1863_v54  ;;  %1646 = vmatprep.subr.mxu1 %v2015_v1 }
  0x68   :  { %1647 = vmatpush3.msra.mxu1 %v2204_v10 }
  0x69   :  { %1648 = vmatprep.subr.mxu1 %v2015_v1 }
  0x6a   :  { %1621 = vmatpush3.bf16.msra.mxu0 %v1863_v54  ;;  %1649 = vmatpush3.msra.mxu1 %v2210_v11 }
  0x6b   :  { %1622 = vmatprep.subr.bf16.mxu0 %v1864_v55  ;;  %1650 = vmatprep.subr.mxu1 %v2015_v1 }
  0x6c   :  { %1651 = vmatpush3.msra.mxu1 %v2216_v12 }
  0x6d   :  { %1652 = vmatprep.subr.mxu1 %v2015_v1 }
  0x6e   :  { %1623 = vmatpush3.bf16.msra.mxu0 %v1864_v55  ;;  %1653 = vmatpush3.msra.mxu1 %v2220_v13 }
  0x6f   :  { %1624 = vmatprep.subr.bf16.mxu0 %v1865_v58  ;;  %1654 = vmatprep.subr.mxu1 %v2015_v1 }
  0x70   :  { %1655 = vmatpush3.msra.mxu1 %v2225_v14 }
  0x71   :  { %1656 = vmatprep.subr.mxu1 %v2015_v1 }
  0x72   :  { %1625 = vmatpush3.bf16.msra.mxu0 %v1865_v58  ;;  %1657 = vmatpush3.msra.mxu1 %v2231_v15 }
  0x73   :  { %1665 = vmatprep.subr.mxu0 %v2015_v1  ;;  %1658 = vmatprep.subr.mxu1 %v2015_v1 }
  0x74   :  { %1659 = vmatpush3.msra.mxu1 %v2237_v16 }
  0x75   :  { %1627 = vmatmul.mubr.msk.bf16.vlgmr.msra.gmra.mxu0 %vm2149_vm10, %v1400_v62  ;;  %1660 = vmatprep.subr.mxu1 %v2015_v1 }
  0x76   :  { %1666 = vmatpush3.msra.mxu0 %v2155_v0  ;;  %1661 = vmatpush3.msra.mxu1 %v2243_v17 }
  0x77   :  { %1667 = vmatprep.subr.mxu0 %v2015_v1  ;;  %1697 = vmatprep.mubr.msk.f32.mxu0 %vm2016_vm11, %v2015_v1 }
  0x78   :  { %1668 = vmatpush3.msra.mxu0 %v2159_v2 }
  0x79   :  { %1669 = vmatprep.subr.mxu0 %v2015_v1 }
  0x7a   :  { %1670 = vmatpush3.msra.mxu0 %v2169_v3 }
  0x7b   :  { %1671 = vmatprep.subr.mxu0 %v2015_v1 }
  0x7c   :  { %1672 = vmatpush3.msra.mxu0 %v2174_v4 }
  0x7d   :  { %1673 = vmatprep.subr.mxu0 %v2015_v1 }
  0x7e   :  { %1674 = vmatpush3.msra.mxu0 %v2180_v5 }
  0x7f   :  { %1675 = vmatprep.subr.mxu0 %v2015_v1 }
  0x80   :  { %1676 = vmatpush3.msra.mxu0 %v2186_v6 }
  0x81   :  { %1677 = vmatprep.subr.mxu0 %v2015_v1 }
  0x82   :  { %1678 = vmatpush3.msra.mxu0 %v2192_v7 }
  0x83   :  { %1679 = vmatprep.subr.mxu0 %v2015_v1 }
  0x84   :  { %1680 = vmatpush3.msra.mxu0 %v2198_v8 }
  0x85   :  { %1681 = vmatprep.subr.mxu0 %v2015_v1 }
  0x86   :  { %1682 = vmatpush3.msra.mxu0 %v2204_v10 }
  0x87   :  { %1683 = vmatprep.subr.mxu0 %v2015_v1 }
  0x88   :  { %1684 = vmatpush3.msra.mxu0 %v2210_v11 }
  0x89   :  { %1685 = vmatprep.subr.mxu0 %v2015_v1 }
  0x8a   :  { %1686 = vmatpush3.msra.mxu0 %v2216_v12 }
  0x8b   :  { %1687 = vmatprep.subr.mxu0 %v2015_v1 }
  0x8c   :  { %1688 = vmatpush3.msra.mxu0 %v2220_v13 }
  0x8d   :  { %1689 = vmatprep.subr.mxu0 %v2015_v1 }
  0x8e   :  { %1690 = vmatpush3.msra.mxu0 %v2225_v14 }
  0x8f   :  { %1691 = vmatprep.subr.mxu0 %v2015_v1 }
  0x90   :  { %1692 = vmatpush3.msra.mxu0 %v2231_v15 }
  0x91   :  { %1693 = vmatprep.subr.mxu0 %v2015_v1 }
  0x92   :  { %1694 = vmatpush3.msra.mxu0 %v2237_v16 }
  0x93   :  { %1695 = vmatprep.subr.mxu0 %v2015_v1 }
  0x94   :  { %1696 = vmatpush3.msra.mxu0 %v2243_v17 }
 0x115   :  { %v1588_v18 = vpop.f32.mrf.mxu0 }
 0x116   :  { %v1608_v19 = vpop.f32.mrf.mxu1 }
 0x117   :  { %v312_v20 = vpop.f32.mrf.mxu0  ;;  %v418_v30 = vadd.f32 %v1608_v19, %v1588_v18  ;;  %v1866_v18 = vld [vmem:[#allocation7 + $0x78] sm:$0xff]   ;;  %v1867_v19 = vld [vmem:[#allocation7 + $0x70] sm:$0xff]  }
 0x118   :  { %v409_v21 = vpop.f32.mrf.mxu1  ;;  %1700 = vmatprep.subr.bf16.mxu1 %v1866_v18 }
 0x119   :  { %v1589_v22 = vpop.f32.mrf.mxu0  ;;  %v410_v28 = vadd.f32 %v409_v21, %v312_v20  ;;  %v1868_v20 = vld [vmem:[#allocation7 + $0x38] sm:$0xff]   ;;  %v1869_v21 = vld [vmem:[#allocation7 + $0x68] sm:$0xff]  }
 0x11a   :  { %v1609_v23 = vpop.f32.mrf.mxu1  ;;  %1720 = vmatprep.subr.bf16.mxu0 %v1868_v20 }
 0x11b   :  { %v315_v24 = vpop.f32.mrf.mxu0  ;;  %v421_v35 = vadd.f32 %v1609_v23, %v1589_v22  ;;  %v1870_v22 = vld [vmem:[#allocation7 + $0x30] sm:$0xff]   ;;  %v1871_v23 = vld [vmem:[#allocation7 + $0x60] sm:$0xff]  }
 0x11c   :  { %v412_v26 = vpop.f32.mrf.mxu1 }
 0x11d   :  { %v413_v32 = vadd.f32 %v412_v26, %v315_v24  ;;  %v1872_v24 = vld [vmem:[#allocation7 + $0x28] sm:$0xff]   ;;  %v1874_v26 = vld [vmem:[#allocation7 + $0x20] sm:$0xff]  }
 0x135   :  { %v1628_v25 = vpop.f32.mrf.mxu0 }
 0x136   :  { %v2257_v36 = vadd.f32 %v1628_v25, %v418_v30  ;;  %v1873_v25 = vld [vmem:[#allocation7 + $0x58] sm:$0xff]   ;;  %v1878_v30 = vld [vmem:[#allocation7 + $0x10] sm:$0xff]  }
 0x137   :  { %v525_v27 = vpop.f32.mrf.mxu0 }
 0x138   :  { %v2255_v33 = vadd.f32 %v525_v27, %v410_v28  ;;  %v555_v44 = vmul.f32 %v2257_v36, %v2257_v36  ;;  %v1875_v27 = vld [vmem:[#allocation7 + $0x50] sm:$0xff]   ;;  %v1876_v28 = vld [vmem:[#allocation7 + $0x18] sm:$0xff]  }
 0x139   :  { %v1629_v29 = vpop.f32.mrf.mxu0 }
 0x13a   :  { %v553_v38 = vmul.f32 %v2255_v33, %v2255_v33  ;;  %v2263_v39 = vadd.f32 %v1629_v29, %v421_v35  ;;  %v1877_v29 = vld [vmem:[#allocation7 + $0x48] sm:$0xff]   ;;  %v1881_v35 = vld [vmem:[#allocation7] sm:$0xff]  }
 0x13b   :  { %v528_v34 = vpop.f32.mrf.mxu0 }
 0x13c   :  { %v2259_v37 = vadd.f32 %v528_v34, %v413_v32  ;;  %v556_v47 = vmul.f32 %v2263_v39, %v2263_v39  ;;  %v1879_v32 = vld [vmem:[#allocation7 + $0x40] sm:$0xff]   ;;  %v1880_v34 = vld [vmem:[#allocation7 + $0x8] sm:$0xff]  }
 0x13e   :  { %v544_v41 = vadd.f32 %v2259_v37, %v2255_v33  ;;  %v554_v43 = vmul.f32 %v2259_v37, %v2259_v37 }
 0x140   :  { %v545_v45 = vadd.f32 %v544_v41, %v2257_v36  ;;  %v557_v46 = vadd.f32 %v554_v43, %v553_v38  ;;  %v1882_v38 = vld [vmem:[#allocation7 + $0xb8] sm:$0xff]  }
 0x142   :  { %v546_v48 = vadd.f32 %v545_v45, %v2263_v39  ;;  %v558_v49 = vadd.f32 %v557_v46, %v555_v44 }
 0x144   :  { %v547_v50 = vrot.slane %v546_v48, 4  ;;  %v559_v51 = vadd.f32 %v558_v49, %v556_v47 }
 0x146   :  { %v548_v52 = vadd.f32 %v547_v50, %v546_v48  ;;  %v560_v53 = vrot.slane %v559_v51, 4 }
 0x148   :  { %v549_v54 = vrot.slane %v548_v52, 2  ;;  %v561_v55 = vadd.f32 %v560_v53, %v559_v51  ;;  %v2277_v51 = vsub.s32 0, %v2087_v9 }
 0x14a   :  { %v550_v56 = vadd.f32 %v549_v54, %v548_v52  ;;  %v562_v57 = vrot.slane %v561_v55, 2 }
 0x14c   :  { %v551_v58 = vrot.slane %v550_v56, 1  ;;  %v563_v59 = vadd.f32 %v562_v57, %v561_v55 }
 0x14e   :  { %v552_v60 = vadd.f32 %v551_v58, %v550_v56  ;;  %v564_v61 = vrot.slane %v563_v59, 1 }
 0x150   :  { %1663 = vmatmul.mubr.f32.vlgmr.msra.gmra.mxu1 %v552_v60  ;;  %v565_v62 = vadd.f32 %v564_v61, %v563_v59  ;;  %v1402_v59 = vld [vmem:[%s2418_s3] ss:$0 sm:$0xff] }
 0x151   :  { %1701 = vmatpush3.bf16.msra.mxu1 %v1866_v18 }
 0x152   :  { %1698 = vmatmul.mubr.f32.vlgmr.msra.gmra.mxu0 %v565_v62  ;;  %1702 = vmatprep.subr.bf16.mxu1 %v1867_v19 }
 0x153   :  { %1721 = vmatpush3.bf16.msra.mxu0 %v1868_v20 }
 0x154   :  { %1722 = vmatprep.subr.bf16.mxu0 %v1870_v22 }
 0x155   :  { %1703 = vmatpush3.bf16.msra.mxu1 %v1867_v19 }
 0x156   :  { %1704 = vmatprep.subr.bf16.mxu1 %v1869_v21 }
 0x157   :  { %1723 = vmatpush3.bf16.msra.mxu0 %v1870_v22 }
 0x158   :  { %1724 = vmatprep.subr.bf16.mxu0 %v1872_v24 }
 0x159   :  { %1705 = vmatpush3.bf16.msra.mxu1 %v1869_v21 }
 0x15a   :  { %1706 = vmatprep.subr.bf16.mxu1 %v1871_v23 }
 0x15b   :  { %1725 = vmatpush3.bf16.msra.mxu0 %v1872_v24 }
 0x15c   :  { %1726 = vmatprep.subr.bf16.mxu0 %v1874_v26 }
 0x15d   :  { %1707 = vmatpush3.bf16.msra.mxu1 %v1871_v23 }
 0x15e   :  { %1708 = vmatprep.subr.bf16.mxu1 %v1873_v25 }
 0x15f   :  { %1727 = vmatpush3.bf16.msra.mxu0 %v1874_v26 }
 0x160   :  { %1728 = vmatprep.subr.bf16.mxu0 %v1876_v28 }
 0x161   :  { %1709 = vmatpush3.bf16.msra.mxu1 %v1873_v25 }
 0x162   :  { %1710 = vmatprep.subr.bf16.mxu1 %v1875_v27 }
 0x163   :  { %1729 = vmatpush3.bf16.msra.mxu0 %v1876_v28 }
 0x164   :  { %1730 = vmatprep.subr.bf16.mxu0 %v1878_v30 }
 0x165   :  { %1711 = vmatpush3.bf16.msra.mxu1 %v1875_v27 }
 0x166   :  { %1712 = vmatprep.subr.bf16.mxu1 %v1877_v29 }
 0x167   :  { %1731 = vmatpush3.bf16.msra.mxu0 %v1878_v30 }
 0x168   :  { %1732 = vmatprep.subr.bf16.mxu0 %v1880_v34 }
 0x169   :  { %1713 = vmatpush3.bf16.msra.mxu1 %v1877_v29 }
 0x16a   :  { %1714 = vmatprep.subr.bf16.mxu1 %v1879_v32 }
 0x16b   :  { %1733 = vmatpush3.bf16.msra.mxu0 %v1880_v34 }
 0x16c   :  { %1734 = vmatprep.subr.bf16.mxu0 %v1881_v35 }
 0x16d   :  { %1715 = vmatpush3.bf16.msra.mxu1 %v1879_v32 }
 0x16e   :  { %1740 = vmatprep.subr.bf16.mxu1 %v1882_v38 }
 0x16f   :  { %1735 = vmatpush3.bf16.msra.mxu0 %v1881_v35 }
 0x170   :  { %1760 = vmatprep.subr.mxu0 %v2015_v1 }
 0x210   :  { %v632_v41 = vpop.f32.mrf.mxu1 }
 0x211   :  { %v636_v43 = vmul.f32 0.001953125, %v632_v41 }
 0x212   :  { %v1664_v44 = vpop.f32.mrf.mxu1  ;;  %v703_v45 = vpop.f32.mrf.mxu0 }
 0x213   :  { %v708_v46 = vmul.f32 %v636_v43, %v636_v43  ;;  %v707_v47 = vmul.f32 0.001953125, %v703_v45  ;;  %v713_v52 = vrot.slane %v636_v43, %v2277_v51  ;;  %v1883_v43 = vld [vmem:[#allocation7 + $0xb0] sm:$0xff]  }
 0x214   :  { %v1699_v48 = vpop.f32.mrf.mxu0 }
 0x215   :  { %v709_v49 = vsub.f32 %v707_v47, %v708_v46  ;;  %v714_v54 = vsub.f32 %v2255_v33, %v713_v52  ;;  %v715_v55 = vsub.f32 %v2259_v37, %v713_v52  ;;  %v716_v56 = vsub.f32 %v2257_v36, %v713_v52  ;;  %v1403_v33 = vld [vmem:[%s2419_s4] ss:$0 sm:$0xff] }
 0x216   :  { %v717_v57 = vsub.f32 %v2263_v39, %v713_v52 }
 0x217   :  { %v718_v50 = vadd.f32 1e-05, %v709_v49 }
 0x219   :  { %1890 = vrsqrt.f32 %v718_v50 }
 0x226   :  { %v1891_v53 = vpop.eup %1890 }
 0x227   :  { %v723_v58 = vrot.slane %v1891_v53, %v2277_v51 }
 0x229   :  { %v724_v60 = vmul.f32 %v723_v58, %v714_v54  ;;  %v725_v61 = vmul.f32 %v723_v58, %v715_v55  ;;  %v726_v62 = vmul.f32 %v723_v58, %v716_v56  ;;  %v727_v18 = vmul.f32 %v723_v58, %v717_v57  ;;  %v1884_v56 = vld [vmem:[#allocation7 + $0xa8] sm:$0xff]   ;;  %v1889_v57 = vld [vmem:[#allocation7 + $0x80] sm:$0xff]  }
 0x22b   :  { %v735_v19 = vmul.f32 %v1402_v59, %v724_v60  ;;  %v736_v37 = vmul.f32 %v1402_v59, %v725_v61  ;;  %v737_v20 = vmul.f32 %v1402_v59, %v726_v62  ;;  %v738_v36 = vmul.f32 %v1402_v59, %v727_v18 }
 0x22d   :  { %v746_v21 = vadd.f32 %v1403_v33, %v735_v19  ;;  %v747_v39 = vadd.f32 %v1403_v33, %v736_v37  ;;  %v748_v22 = vadd.f32 %v1403_v33, %v737_v20  ;;  %v749_v23 = vadd.f32 %v1403_v33, %v738_v36 }
 0x22f   :  { %v2291_v24 = vmax.f32 %v746_v21, 0.0  ;;  %v751_v25 = vmax.f32 %v747_v39, 0.0  ;;  %v2293_v26 = vmax.f32 %v748_v22, 0.0  ;;  %v2295_v27 = vmax.f32 %v749_v23, 0.0 }
 0x231   :  { %v796_v28 = vpack.c.bf16 %v751_v25, %v2291_v24  ;;  %v756_v29 = vrot.slane %v2293_v26, 7  ;;  %v797_v30 = vpack.c.bf16 %v2295_v27, %v2293_v26  ;;  %v754_v32 = vrot.slane %v2291_v24, 7 }
 0x232   :  { %v755_v34 = vrot.slane %v751_v25, 7  ;;  %v757_v35 = vrot.slane %v2295_v27, 7  ;;  %v766_v41 = vrot.slane %v2291_v24, 1  ;;  %v767_v44 = vrot.slane %v751_v25, 1 }
 0x233   :  { %1716 = vmatprep.mubr.bf16.mxu1 %v796_v28  ;;  %v768_v45 = vrot.slane %v2293_v26, 1  ;;  %v769_v58 = vrot.slane %v2295_v27, 1 }
 0x234   :  { %1717 = vmatmul.mubr.bf16.vlgmr.msra.gmra.mxu1 %v797_v30  ;;  %v760_v46 = vsel %vm171_vm1, %v754_v32, %v755_v34  ;;  %v761_v47 = vsel %vm171_vm1, %v757_v35, %v754_v32  ;;  %v758_v48 = vsel %vm171_vm1, %v756_v29, %v757_v35  ;;  %v759_v49 = vsel %vm171_vm1, %v755_v34, %v756_v29 }
 0x235   :  { %1741 = vmatpush3.bf16.msra.mxu1 %v1882_v38  ;;  %v1421_v50 = vpack.c.bf16 %v760_v46, %v761_v47  ;;  %v771_v52 = vsel %vm184_vm7, %v767_v44, %v768_v45  ;;  %v772_v53 = vsel %vm184_vm7, %v766_v41, %v767_v44  ;;  %v1424_v54 = vpack.c.bf16 %v758_v48, %v759_v49  ;;  %v1885_v38 = vld [vmem:[#allocation7 + $0xa0] sm:$0xff]  }
 0x236   :  { %v1435_v55 = vpack.c.bf16 %v771_v52, %v772_v53  ;;  %1742 = vmatprep.subr.bf16.mxu1 %v1883_v43  ;;  %v770_v59 = vsel %vm184_vm7, %v768_v45, %v769_v58  ;;  %v773_v60 = vsel %vm184_vm7, %v769_v58, %v766_v41 }
 0x237   :  { %1736 = vmatprep.mubr.msk.bf16.mxu0 %vm2111_vm3, %v1421_v50  ;;  %v1438_v61 = vpack.c.bf16 %v773_v60, %v770_v59 }
 0x238   :  { %1756 = vmatprep.mubr.msk.bf16.mxu1 %vm2125_vm8, %v1435_v55  ;;  %1737 = vmatmul.mubr.msk.bf16.vlgmr.msra.gmra.mxu0 %vm2119_vm6, %v1424_v54 }
 0x239   :  { %1743 = vmatpush3.bf16.msra.mxu1 %v1883_v43  ;;  %1761 = vmatpush3.msra.mxu0 %v2155_v0 }
 0x23a   :  { %1744 = vmatprep.subr.bf16.mxu1 %v1884_v56  ;;  %1762 = vmatprep.subr.mxu0 %v2015_v1 }
 0x23b   :  { %1763 = vmatpush3.msra.mxu0 %v2159_v2  ;;  %1792 = vmatprep.mubr.msk.f32.mxu0 %vm2016_vm11, %v2015_v1 }
 0x23c   :  { %1764 = vmatprep.subr.mxu0 %v2015_v1 }
 0x23d   :  { %1745 = vmatpush3.bf16.msra.mxu1 %v1884_v56  ;;  %1765 = vmatpush3.msra.mxu0 %v2169_v3 }
 0x23e   :  { %1746 = vmatprep.subr.bf16.mxu1 %v1885_v38  ;;  %1766 = vmatprep.subr.mxu0 %v2015_v1 }
 0x23f   :  { %1767 = vmatpush3.msra.mxu0 %v2174_v4 }
 0x240   :  { %1768 = vmatprep.subr.mxu0 %v2015_v1 }
 0x241   :  { %1747 = vmatpush3.bf16.msra.mxu1 %v1885_v38  ;;  %1769 = vmatpush3.msra.mxu0 %v2180_v5 }
 0x242   :  { %1748 = vmatprep.subr.bf16.mxu1 %v1886_v31  ;;  %1770 = vmatprep.subr.mxu0 %v2015_v1 }
 0x243   :  { %1771 = vmatpush3.msra.mxu0 %v2186_v6 }
 0x244   :  { %1772 = vmatprep.subr.mxu0 %v2015_v1 }
 0x245   :  { %1749 = vmatpush3.bf16.msra.mxu1 %v1886_v31  ;;  %1773 = vmatpush3.msra.mxu0 %v2192_v7 }
 0x246   :  { %1750 = vmatprep.subr.bf16.mxu1 %v1887_v40  ;;  %1774 = vmatprep.subr.mxu0 %v2015_v1 }
 0x247   :  { %1775 = vmatpush3.msra.mxu0 %v2198_v8 }
 0x248   :  { %1776 = vmatprep.subr.mxu0 %v2015_v1 }
 0x249   :  { %1751 = vmatpush3.bf16.msra.mxu1 %v1887_v40  ;;  %1777 = vmatpush3.msra.mxu0 %v2204_v10 }
 0x24a   :  { %1752 = vmatprep.subr.bf16.mxu1 %v1888_v42  ;;  %1778 = vmatprep.subr.mxu0 %v2015_v1 }
 0x24b   :  { %1779 = vmatpush3.msra.mxu0 %v2210_v11 }
 0x24c   :  { %1780 = vmatprep.subr.mxu0 %v2015_v1 }
 0x24d   :  { %1753 = vmatpush3.bf16.msra.mxu1 %v1888_v42  ;;  %1781 = vmatpush3.msra.mxu0 %v2216_v12 }
 0x24e   :  { %1754 = vmatprep.subr.bf16.mxu1 %v1889_v57  ;;  %1782 = vmatprep.subr.mxu0 %v2015_v1 }
 0x24f   :  { %1783 = vmatpush3.msra.mxu0 %v2220_v13 }
 0x250   :  { %1784 = vmatprep.subr.mxu0 %v2015_v1 }
 0x251   :  { %1755 = vmatpush3.bf16.msra.mxu1 %v1889_v57  ;;  %1785 = vmatpush3.msra.mxu0 %v2225_v14  ;;  %v1440_v57 = vld [vmem:[%s2420_s5] ss:$0 sm:$0xff]  ;;  %s1978_s5 = scalar_lea.vmem %s1353_s10, 512 }
 0x252   :  { %1795 = vmatprep.subr.mxu1 %v2015_v1  ;;  %1786 = vmatprep.subr.mxu0 %v2015_v1  ;;  %p1979_p6 = scmp.ne.s32.totalorder %s1353_s10, %s1978_s5  ;;  %p1984_p8 = scmp.lt.s32.totalorder %s1978_s5, %s1978_s5 }
 0x253   :  { %1787 = vmatpush3.msra.mxu0 %v2231_v15 }
 0x254   :  { %1757 = vmatmul.mubr.msk.bf16.vlgmr.msra.gmra.mxu1 %vm2149_vm10, %v1438_v61  ;;  %1788 = vmatprep.subr.mxu0 %v2015_v1  ;;  %p1985_p9 = por %p1984_p8, %p1983_p7 }
 0x255   :  { %1796 = vmatpush3.msra.mxu1 %v2155_v0  ;;  %1789 = vmatpush3.msra.mxu0 %v2237_v16 }
 0x256   :  { %1797 = vmatprep.subr.mxu1 %v2015_v1  ;;  %1790 = vmatprep.subr.mxu0 %v2015_v1  ;;  %p1986_p10 = pnand %p1985_p9, %p1979_p6 }
 0x257   :  { %1798 = vmatpush3.msra.mxu1 %v2159_v2  ;;  %1791 = vmatpush3.msra.mxu0 %v2243_v17 }
 0x258   :  { %1799 = vmatprep.subr.mxu1 %v2015_v1  ;;  %1827 = vmatprep.mubr.msk.f32.mxu1 %vm2016_vm11, %v2015_v1 }
 0x259   :  { %1800 = vmatpush3.msra.mxu1 %v2169_v3 }
 0x25a   :  { %1801 = vmatprep.subr.mxu1 %v2015_v1 }
 0x25b   :  { %1802 = vmatpush3.msra.mxu1 %v2174_v4 }
 0x25c   :  { %1803 = vmatprep.subr.mxu1 %v2015_v1 }
 0x25d   :  { %1804 = vmatpush3.msra.mxu1 %v2180_v5 }
 0x25e   :  { %1805 = vmatprep.subr.mxu1 %v2015_v1 }
 0x25f   :  { %1806 = vmatpush3.msra.mxu1 %v2186_v6 }
 0x260   :  { %1807 = vmatprep.subr.mxu1 %v2015_v1 }
 0x261   :  { %1808 = vmatpush3.msra.mxu1 %v2192_v7 }
 0x262   :  { %1809 = vmatprep.subr.mxu1 %v2015_v1 }
 0x263   :  { %1810 = vmatpush3.msra.mxu1 %v2198_v8 }
 0x264   :  { %1811 = vmatprep.subr.mxu1 %v2015_v1 }
 0x265   :  { %1812 = vmatpush3.msra.mxu1 %v2204_v10 }
 0x266   :  { %1813 = vmatprep.subr.mxu1 %v2015_v1 }
 0x267   :  { %1814 = vmatpush3.msra.mxu1 %v2210_v11 }
 0x268   :  { %1815 = vmatprep.subr.mxu1 %v2015_v1 }
 0x269   :  { %1816 = vmatpush3.msra.mxu1 %v2216_v12 }
 0x26a   :  { %1817 = vmatprep.subr.mxu1 %v2015_v1 }
 0x26b   :  { %1818 = vmatpush3.msra.mxu1 %v2220_v13 }
 0x26c   :  { %1819 = vmatprep.subr.mxu1 %v2015_v1 }
 0x26d   :  { %1820 = vmatpush3.msra.mxu1 %v2225_v14 }
 0x26e   :  { %1821 = vmatprep.subr.mxu1 %v2015_v1 }
 0x26f   :  { %1822 = vmatpush3.msra.mxu1 %v2231_v15 }
 0x270   :  { %1823 = vmatprep.subr.mxu1 %v2015_v1 }
 0x271   :  { %1824 = vmatpush3.msra.mxu1 %v2237_v16 }
 0x272   :  { %1825 = vmatprep.subr.mxu1 %v2015_v1 }
 0x273   :  { %1826 = vmatpush3.msra.mxu1 %v2243_v17 }
 0x2f4   :  { %v1718_v9 = vpop.f32.mrf.mxu1 }
 0x2f6   :  { %v897_v63 = vpop.f32.mrf.mxu1 }
 0x2f8   :  { %v1738_v0 = vpop.f32.mrf.mxu0  ;;  %v1719_v2 = vpop.f32.mrf.mxu1 }
 0x2f9   :  { %v1003_v12 = vadd.f32 %v1738_v0, %v1718_v9  ;;  %v1441_v9 = vld [vmem:[%s2421_s6] ss:$0 sm:$0xff] }
 0x2fa   :  { %v994_v3 = vpop.f32.mrf.mxu0  ;;  %v900_v4 = vpop.f32.mrf.mxu1 }
 0x2fb   :  { %v995_v10 = vadd.f32 %v994_v3, %v897_v63 }
 0x2fc   :  { %v1739_v5 = vpop.f32.mrf.mxu0 }
 0x2fd   :  { %v1006_v16 = vadd.f32 %v1739_v5, %v1719_v2 }
 0x2fe   :  { %v997_v7 = vpop.f32.mrf.mxu0 }
 0x2ff   :  { %v998_v13 = vadd.f32 %v997_v7, %v900_v4  ;;  %v1894_v7 = vld [vmem:[#allocation2] sm:$0xff] }
 0x314   :  { %v1758_v6 = vpop.f32.mrf.mxu1 }
 0x315   :  { %v1127_v1 = vadd.f32 %v1758_v6, %v1003_v12  ;;  %v1896_v12 = vld [vmem:[#allocation2 + $0x10] sm:$0xff] }
 0x316   :  { %v1110_v8 = vpop.f32.mrf.mxu1 }
 0x317   :  { %v1125_v14 = vadd.f32 %v1110_v8, %v995_v10  ;;  %v1140_v37 = vmul.f32 %v1127_v1, %v1127_v1  ;;  %v1895_v10 = vld [vmem:[#allocation2 + $0x8] sm:$0xff] }
 0x318   :  { %v1759_v11 = vpop.f32.mrf.mxu1 }
 0x319   :  { %v1138_v17 = vmul.f32 %v1125_v14, %v1125_v14  ;;  %v1128_v18 = vadd.f32 %v1759_v11, %v1006_v16 }
 0x31a   :  { %v1113_v15 = vpop.f32.mrf.mxu1 }
 0x31b   :  { %v1126_v62 = vadd.f32 %v1113_v15, %v998_v13  ;;  %v1141_v21 = vmul.f32 %v1128_v18, %v1128_v18 }
 0x31d   :  { %v1129_v33 = vadd.f32 %v1126_v62, %v1125_v14  ;;  %v1139_v19 = vmul.f32 %v1126_v62, %v1126_v62 }
 0x31f   :  { %v1130_v20 = vadd.f32 %v1129_v33, %v1127_v1  ;;  %v1142_v36 = vadd.f32 %v1139_v19, %v1138_v17 }
 0x321   :  { %v1131_v39 = vadd.f32 %v1130_v20, %v1128_v18  ;;  %v1143_v22 = vadd.f32 %v1142_v36, %v1140_v37 }
 0x323   :  { %v1132_v23 = vrot.slane %v1131_v39, 4  ;;  %v1144_v24 = vadd.f32 %v1143_v22, %v1141_v21 }
 0x325   :  { %v1133_v25 = vadd.f32 %v1132_v23, %v1131_v39  ;;  %v1145_v26 = vrot.slane %v1144_v24, 4 }
 0x327   :  { %v1134_v27 = vrot.slane %v1133_v25, 2  ;;  %v1146_v28 = vadd.f32 %v1145_v26, %v1144_v24 }
 0x329   :  { %v1135_v29 = vadd.f32 %v1134_v27, %v1133_v25  ;;  %v1147_v30 = vrot.slane %v1146_v28, 2 }
 0x32b   :  { %v1136_v32 = vrot.slane %v1135_v29, 1  ;;  %v1148_v34 = vadd.f32 %v1147_v30, %v1146_v28 }
 0x32d   :  { %v1137_v35 = vadd.f32 %v1136_v32, %v1135_v29  ;;  %v1149_v41 = vrot.slane %v1148_v34, 1 }
 0x32f   :  { %1793 = vmatmul.mubr.f32.vlgmr.msra.gmra.mxu0 %v1137_v35  ;;  %v1150_v43 = vadd.f32 %v1149_v41, %v1148_v34 }
 0x331   :  { %1828 = vmatmul.mubr.f32.vlgmr.msra.gmra.mxu1 %v1150_v43 }
 0x3ef   :  { %v1217_v44 = vpop.f32.mrf.mxu0 }
 0x3f0   :  { %v1221_v45 = vmul.f32 0.001953125, %v1217_v44 }
 0x3f1   :  { %v1794_v46 = vpop.f32.mrf.mxu0  ;;  %v1288_v47 = vpop.f32.mrf.mxu1 }
 0x3f2   :  { %v1293_v48 = vmul.f32 %v1221_v45, %v1221_v45  ;;  %v1292_v49 = vmul.f32 0.001953125, %v1288_v47  ;;  %v1298_v54 = vrot.slane %v1221_v45, %v2277_v51 }
 0x3f3   :  { %v1829_v50 = vpop.f32.mrf.mxu1 }
 0x3f4   :  { %v1294_v52 = vsub.f32 %v1292_v49, %v1293_v48  ;;  %v1299_v56 = vsub.f32 %v1125_v14, %v1298_v54  ;;  %v1300_v38 = vsub.f32 %v1126_v62, %v1298_v54  ;;  %v1301_v31 = vsub.f32 %v1127_v1, %v1298_v54  ;;  %v1897_v14 = vld [vmem:[#allocation2 + $0x18] sm:$0xff] }
 0x3f5   :  { %v1302_v40 = vsub.f32 %v1128_v18, %v1298_v54 }
 0x3f6   :  { %v1303_v53 = vadd.f32 1e-05, %v1294_v52 }
 0x3f8   :  { %1892 = vrsqrt.f32 %v1303_v53 }
 0x405   :  { %v1893_v55 = vpop.eup %1892 }
 0x406   :  { %v1308_v42 = vrot.slane %v1893_v55, %v2277_v51 }
 0x408   :  { %v1309_v58 = vmul.f32 %v1308_v42, %v1299_v56  ;;  %v1310_v59 = vmul.f32 %v1308_v42, %v1300_v38  ;;  %v1311_v60 = vmul.f32 %v1308_v42, %v1301_v31  ;;  %v1312_v61 = vmul.f32 %v1308_v42, %v1302_v40 }
 0x40a   :  { %v1320_v63 = vmul.f32 %v1440_v57, %v1309_v58  ;;  %v1321_v0 = vmul.f32 %v1440_v57, %v1310_v59  ;;  %v1322_v2 = vmul.f32 %v1440_v57, %v1311_v60  ;;  %v1323_v3 = vmul.f32 %v1440_v57, %v1312_v61 }
 0x40c   :  { %v1331_v4 = vadd.f32 %v1441_v9, %v1320_v63  ;;  %v1332_v5 = vadd.f32 %v1441_v9, %v1321_v0  ;;  %v1333_v6 = vadd.f32 %v1441_v9, %v1322_v2  ;;  %v1334_v51 = vadd.f32 %v1441_v9, %v1323_v3 }
 0x40e   :  { %v1335_v8 = vadd.f32 %v1894_v7, %v1331_v4  ;;  %v1336_v11 = vadd.f32 %v1895_v10, %v1332_v5  ;;  %v1337_v13 = vadd.f32 %v1896_v12, %v1333_v6  ;;  %v1338_v15 = vadd.f32 %v1897_v14, %v1334_v51 }
 0x410   :  { %v1339_v16 = vmax.f32 %v1335_v8, 0.0  ;;  %v1340_v1 = vmax.f32 %v1336_v11, 0.0  ;;  %v1341_v62 = vmax.f32 %v1337_v13, 0.0  ;;  %v1342_v17 = vmax.f32 %v1338_v15, 0.0 }
 0x412   :  { %1343 = vst [vmem:[#allocation10] sm:$0xff] %v1339_v16  ;;  %1344 = vst [vmem:[#allocation10 + $0x8] sm:$0xff] %v1340_v1 }
 0x413   :  { %1345 = vst [vmem:[#allocation10 + $0x10] sm:$0xff] %v1341_v62  ;;  %1346 = vst [vmem:[#allocation10 + $0x18] sm:$0xff] %v1342_v17 }
 0x414   :  { %1989 = shalt.err (!%p1986_p10)
}
 0x415   :  { %1358 = dma.vmem_to_hbm [thread:$0]  %s1353_s10, 512, %s2423_s8, [#allocation4], %s2010_s15, %s2010_s15, %s2011_s16  }
 0x416   :  { %2004 = dma.done.wait [#allocation4], 512  }
 0x417   :  { %2005 = vsyncadd [#allocation4], 4294966784 }
 0x418   :  { %1362 = vsyncpa [#allocation3], 1 }
 0x419   :  { %1363 = vsyncpa [#allocation6], 1 }
 0x41a   :  { %1364 = vsyncpa [#allocation9], 1 }
 0x41b   :  { %1365 = vsyncpa [#allocation4], 1 }

</bundles_post_ra>
